<compile_context>
chip_gen: v6e
topology: v6e:2x2x1
jax: 0.10.0
libtpu: 0.0.40
codegen_flags: <defaults>
</compile_context>

<pallas_src>
import jax
import jax.numpy as jnp
from jax.experimental import pallas as pl
from jax.experimental.pallas import tpu as pltpu


# ----------------------------- kernel bodies --------------------------------

def _vdrop_kernel_2d(mask_ref, x_ref, o_ref):
    """x_ref: (ts, tl), mask_ref: (1, tl).  Lane-dense row-broadcast multiply."""
    o_ref[...] = x_ref[...] * mask_ref[...]


def _vdrop_kernel_batch_major(mask_ref, x_ref, o_ref):
    """x_ref: (tb, ts, th), mask_ref: (tb, th).  Mask broadcasts over seq."""
    o_ref[...] = x_ref[...] * mask_ref[...][:, None, :]


# --------------------------- tiling heuristics -------------------------------

def _tpu_flavor():
    """Returns (target_block_bytes, min_parallel_grid_steps) per generation."""
    kind = ""
    try:
        kind = jax.devices()[0].device_kind.lower()
    except Exception:
        pass
    if ("v7" in kind) or ("7x" in kind):
        # v7x: 3.2 TB/s HBM -> bigger blocks amortize the ~0.35us/step overhead;
        # 2 TensorCores -> keep >= 2 parallel grid steps when splittable.
        return 4 * 1024 * 1024, 2
    # v5e / v6e: 2 MiB blocks already hit ~85% of the HBM roofline; 1 TC/chip.
    return 2 * 1024 * 1024, 1


def _aligned_tile(dim, align, max_elems):
    """Largest tile of `dim` that fits `max_elems` elements and is either the
    full dim or a multiple of `align` (floored at `align`)."""
    if dim <= max_elems:
        return dim
    t = max(align, (max_elems // align) * align)
    return t if t < dim else dim


def _with_min_steps(tile, dim, align, min_steps):
    """Shrink `tile` (keeping alignment) so the axis has >= min_steps grid
    steps, when `dim` is large enough to split on `align` boundaries."""
    if min_steps <= 1 or pl.cdiv(dim, tile) >= min_steps:
        return tile
    t = pl.cdiv(dim, min_steps)
    t = pl.cdiv(t, align) * align          # round up to alignment
    return min(tile, max(align, t))


# ------------------------------- wrapper -------------------------------------

def variational_dropout(x, key, *, dropout, batch_first=False, training=True):
    """JAX/Pallas equivalent of VariationalDropout.forward (dense-tensor path)."""
    if (not training) or dropout <= 0.0:
        return x

    keep_prob = 1.0 - float(dropout)
    if batch_first:
        batch, seq, hidden = x.shape
    else:
        seq, batch, hidden = x.shape

    # One Bernoulli(1 - dropout) mask per (batch, hidden), shared across seq.
    # Fold the 1/(1-p) scale into the mask and keep it in x.dtype so the kernel
    # body is a single multiply with no dtype converts (scale quantization to
    # x.dtype is numerically benign for dropout).
    keep = jax.random.bernoulli(key, p=keep_prob, shape=(batch, hidden))
    mask = jnp.where(keep,
                     jnp.asarray(1.0 / keep_prob, dtype=x.dtype),
                     jnp.zeros((), dtype=x.dtype))

    itemsize = jnp.dtype(x.dtype).itemsize
    target_bytes, min_steps = _tpu_flavor()
    target_elems = max(1024, target_bytes // itemsize)
    vmem_limit = 32 * 1024 * 1024   # 2 bufs x (in + out) x block + mask << 32 MiB

    if batch_first:
        # x: (B, S, H); block (tb, ts, th) with a resident (tb, th) mask block.
        # tb >= 8 (or the full batch) so the mask block is never a (1, H) slab.
        th = _aligned_tile(hidden, 128, max(128, target_elems // 64))
        tb = _aligned_tile(batch, 8, max(8, target_elems // (th * 8)))
        ts = _aligned_tile(seq, 8, max(8, target_elems // (th * tb)))
        nb, nh, ns = pl.cdiv(batch, tb), pl.cdiv(hidden, th), pl.cdiv(seq, ts)
        if nb * nh * ns < min_steps:
            ts = _with_min_steps(ts, seq, 8, min_steps)
            ns = pl.cdiv(seq, ts)
        grid = (nb, nh, ns)   # seq iterates fastest -> mask block stays resident

        return pl.pallas_call(
            _vdrop_kernel_batch_major,
            out_shape=jax.ShapeDtypeStruct(x.shape, x.dtype),
            grid=grid,
            in_specs=[
                pl.BlockSpec((tb, th), lambda b, h, s: (b, h)),         # scaled mask
                pl.BlockSpec((tb, ts, th), lambda b, h, s: (b, s, h)),  # x tile
            ],
            out_specs=pl.BlockSpec((tb, ts, th), lambda b, h, s: (b, s, h)),
            compiler_params=pltpu.CompilerParams(
                dimension_semantics=("parallel", "parallel", "parallel"),
                vmem_limit_bytes=vmem_limit,
            ),
        )(mask, x)

    # batch_first=False: x is (S, B, H).  Flatten to a lane-dense 2D view
    # (S, B*H) (free row-major metadata reshape); the mask becomes a single
    # (1, B*H) row shared by every sequence step.
    lanes = batch * hidden
    x2 = x.reshape(seq, lanes)
    mask2 = mask.reshape(1, lanes)

    tl = _aligned_tile(lanes, 128, max(128, target_elems // 8))
    ts = _aligned_tile(seq, 8, max(8, target_elems // tl))
    nl, ns = pl.cdiv(lanes, tl), pl.cdiv(seq, ts)
    if nl * ns < min_steps:
        ts = _with_min_steps(ts, seq, 8, min_steps)
        ns = pl.cdiv(seq, ts)
    grid = (nl, ns)   # seq iterates fastest -> mask row stays resident per lane tile

    out2 = pl.pallas_call(
        _vdrop_kernel_2d,
        out_shape=jax.ShapeDtypeStruct((seq, lanes), x.dtype),
        grid=grid,
        in_specs=[
            pl.BlockSpec((1, tl), lambda l, s: (0, l)),    # scaled mask row
            pl.BlockSpec((ts, tl), lambda l, s: (s, l)),   # x tile
        ],
        out_specs=pl.BlockSpec((ts, tl), lambda l, s: (s, l)),
        compiler_params=pltpu.CompilerParams(
            dimension_semantics=("parallel", "parallel"),
            vmem_limit_bytes=vmem_limit,
        ),
    )(mask2, x2)
    return out2.reshape(seq, batch, hidden)


# --------------------------------- test ---------------------------------------

if __name__ == "__main__":
    root = jax.random.PRNGKey(0)
    x_key, m_key = jax.random.split(root)

    seq, batch, hidden = 16, 8, 128
    dropout = 0.3
    keep_prob = 1.0 - dropout

    # ---- batch_first=False layout: (seq, batch, hidden) ---------------------
    x = jax.random.normal(x_key, (seq, batch, hidden), dtype=jnp.float32)
    y = jax.block_until_ready(
        variational_dropout(x, m_key, dropout=dropout, batch_first=False, training=True))

    keep = jax.random.bernoulli(m_key, p=keep_prob, shape=(batch, hidden))
    scale = jnp.where(keep, jnp.float32(1.0 / keep_prob), jnp.float32(0.0))
    ref = x * scale[None, :, :]
    assert jnp.allclose(y, ref, rtol=1e-6, atol=1e-6), "mismatch vs reference (seq-major)"

    dropped = (y == 0.0) & (x != 0.0)
    assert bool(jnp.all(dropped == dropped[0:1])), "mask not shared across the sequence axis"

    # ---- batch_first=True layout: (batch, seq, hidden) ----------------------
    xb = jnp.transpose(x, (1, 0, 2))
    yb = jax.block_until_ready(
        variational_dropout(xb, m_key, dropout=dropout, batch_first=True, training=True))
    refb = xb * scale[:, None, :]
    assert jnp.allclose(yb, refb, rtol=1e-6, atol=1e-6), "mismatch vs reference (batch-major)"

    # ---- eval / dropout<=0 paths are identity --------------------------------
    y_eval = variational_dropout(x, m_key, dropout=dropout, training=False)
    y_zero = variational_dropout(x, m_key, dropout=0.0, training=True)
    assert jnp.array_equal(y_eval, x) and jnp.array_equal(y_zero, x), "identity path broken"

    print("KERNEL_OK")
</pallas_src>

<mosaic_0001>
module attributes {stable_mosaic.version = 11 : i64} {
  func.func @_vdrop_kernel_2d(%arg0: i32, %arg1: i32, %arg2: memref<1x1024xf32, #tpu.memory_space<vmem>>, %arg3: memref<16x1024xf32, #tpu.memory_space<vmem>>, %arg4: memref<16x1024xf32, #tpu.memory_space<vmem>>) attributes {dimension_semantics = [#tpu.dimension_semantics<parallel>, #tpu.dimension_semantics<parallel>], iteration_bounds = array<i64: 1, 1>, scalar_prefetch = 0 : i64, scratch_operands = 0 : i64, tpu.core_type = #tpu.core_type<tc>, window_params = [{transform_indices = @transform_0, window_bounds = array<i64: 1, 1024>}, {transform_indices = @transform_1, window_bounds = array<i64: 16, 1024>}, {transform_indices = @transform_2, window_bounds = array<i64: 16, 1024>}]} {
    %c0 = arith.constant 0 : index
    %c0_0 = arith.constant 0 : index
    %0 = vector.load %arg3[%c0, %c0_0] : memref<16x1024xf32, #tpu.memory_space<vmem>>, vector<16x1024xf32>
    %c0_1 = arith.constant 0 : index
    %c0_2 = arith.constant 0 : index
    %1 = vector.load %arg2[%c0_1, %c0_2] : memref<1x1024xf32, #tpu.memory_space<vmem>>, vector<1x1024xf32>
    %2 = vector.broadcast %1 : vector<1x1024xf32> to vector<16x1024xf32>
    %3 = arith.mulf %0, %2 : vector<16x1024xf32>
    %c0_3 = arith.constant 0 : index
    %c0_4 = arith.constant 0 : index
    %4 = vector.load %arg4[%c0_3, %c0_4] : memref<16x1024xf32, #tpu.memory_space<vmem>>, vector<16x1024xf32>
    tpu.vector_store %arg4[%c0_3, %c0_4], %3 {strides = array<i32>} : memref<16x1024xf32, #tpu.memory_space<vmem>>, vector<16x1024xf32>,
    return
  }
  func.func @transform_0(%arg0: i32, %arg1: i32) -> (i32, i32) {
    %c0_i32 = arith.constant 0 : i32
    %c0_i32_0 = arith.constant 0 : i32
    return %c0_i32, %arg0 : i32, i32
  }
  func.func @transform_1(%arg0: i32, %arg1: i32) -> (i32, i32) {
    %c0_i32 = arith.constant 0 : i32
    return %arg1, %arg0 : i32, i32
  }
  func.func @transform_2(%arg0: i32, %arg1: i32) -> (i32, i32) {
    %c0_i32 = arith.constant 0 : i32
    return %arg1, %arg0 : i32, i32
  }
}

</mosaic_0001>

<bundles_post_ra>
// kernel: tpu_custom_call.1
= control target key start
LH: loop header
LB: loop body
LE: loop exit
PB: predicated region body
PF: predicated region fallthrough
CT: control target
= control target key end

     0   :  { %7 = vsyncpa [#allocation3], 0  ;;  %s252_s0 = inlined_call_operand.hbm [shape: f32[1,1024], index: 0, kind: input, shape index: {}]   ;;  %s253_s1 = inlined_call_operand.hbm [shape: f32[16,1024], index: 1, kind: input, shape index: {}]   ;;  %s254_s2 = inlined_call_operand.hbm [shape: f32[16,1024], index: 2, kind: output, shape index: {}]  }
   0x1   :  { %8 = vsyncpa [#allocation6], 0 }
   0x2   :  { %9 = vsyncpa [#allocation4], 0  ;;  %s217_s9 = smov [#allocation2]   ;;  %s218_s11 = smov [#allocation5]  }
   0x3   :  { %s16_s10 = sshll.u32 %s217_s9, 4  ;;  %s25_s12 = sshll.u32 %s218_s11, 4  ;;  %s17_s10 = int_to_ptr.vmem [resolvable:$true] %s16_s10  ;;  %s26_s12 = int_to_ptr.vmem [resolvable:$true] %s25_s12 }
   0x4   :  { %s159_s13 = scalar_lea.vmem %s17_s10, 128  ;;  %p164_p1 = scmp.lt.s32.totalorder %s17_s10, %s17_s10 }
   0x5   :  { %p160_p0 = scmp.ne.s32.totalorder %s17_s10, %s159_s13  ;;  %p165_p2 = scmp.lt.s32.totalorder %s159_s13, %s159_s13 }
   0x7   :  { %p166_p3 = por %p165_p2, %p164_p1 }
   0x9   :  { %p167_p4 = pnand %p166_p3, %p160_p0 }
   0xb   :  { %170 = shalt.err (!%p167_p4)
}
   0xc   :  { %19 = dma.hbm_to_vmem [thread:$0]  %s252_s0, 128, %s17_s10, [#allocation3]  }
   0xd   :  { %s179_s16 = scalar_lea.vmem %s26_s12, 2048  ;;  %p184_p6 = scmp.lt.s32.totalorder %s26_s12, %s26_s12 }
   0xe   :  { %p180_p5 = scmp.ne.s32.totalorder %s26_s12, %s179_s16  ;;  %p185_p7 = scmp.lt.s32.totalorder %s179_s16, %s179_s16 }
  0x10   :  { %p186_p8 = por %p185_p7, %p184_p6 }
  0x12   :  { %p187_p9 = pnand %p186_p8, %p180_p5 }
  0x14   :  { %190 = shalt.err (!%p187_p9)
}
  0x15   :  { %s219_s17 = smov 1024   ;;  %s220_s18 = smov 64  }
  0x16   :  { %31 = dma.hbm_to_vmem [thread:$0]  %s253_s1, 2048, %s26_s12, [#allocation6], %s219_s17, %s219_s17, %s220_s18  }
  0x17   :  { %211 = dma.done.wait [#allocation3], 128  }
  0x18   :  { %212 = vsyncadd [#allocation3], 4294967168 }
  0x19   :  { %213 = dma.done.wait [#allocation6], 2048  }
  0x1a   :  { %214 = vsyncadd [#allocation6], 4294965248  ;;  %v56_v0 = vlaneseq  ;;  %v38_v10 = vld [vmem:[#allocation5] sm:$0xff]  ;;  %v54_v11 = vld [vmem:[#allocation2] sm:$0xff]  ;;  %s221_s0 = smov [#allocation7]  }
  0x1b   :  { %v39_v12 = vld [vmem:[#allocation5 + $0x8] sm:$0xff]  ;;  %v40_v15 = vld [vmem:[#allocation5 + $0x10] sm:$0xff]  ;;  %v41_v17 = vld [vmem:[#allocation5 + $0x18] sm:$0xff]  ;;  %s133_s1 = sshll.u32 %s221_s0, 4  ;;  %s134_s1 = int_to_ptr.vmem [resolvable:$true] %s133_s1 }
  0x1c   :  { %v57_v1 = vshrl.u32 %v56_v0, 7  ;;  %v42_v19 = vld [vmem:[#allocation5 + $0x20] sm:$0xff]  ;;  %v43_v21 = vld [vmem:[#allocation5 + $0x28] sm:$0xff]  ;;  %v44_v23 = vld [vmem:[#allocation5 + $0x30] sm:$0xff]  ;;  %s191_s21 = scalar_lea.vmem %s134_s1, 2048  ;;  %p196_p11 = scmp.lt.s32.totalorder %s134_s1, %s134_s1 }
  0x1d   :  { %v45_v25 = vld [vmem:[#allocation5 + $0x38] sm:$0xff]  ;;  %v46_v31 = vld [vmem:[#allocation5 + $0x40] sm:$0xff]  ;;  %v47_v32 = vld [vmem:[#allocation5 + $0x48] sm:$0xff]  ;;  %p192_p10 = scmp.ne.s32.totalorder %s134_s1, %s191_s21  ;;  %p197_p12 = scmp.lt.s32.totalorder %s191_s21, %s191_s21 }
  0x1e   :  { %v58_v2 = vsub.s32 0, %v57_v1  ;;  %v62_v3 = vsub.s32 1, %v57_v1  ;;  %v66_v4 = vsub.s32 2, %v57_v1  ;;  %v70_v5 = vsub.s32 3, %v57_v1  ;;  %v48_v33 = vld [vmem:[#allocation5 + $0x50] sm:$0xff]  ;;  %v49_v38 = vld [vmem:[#allocation5 + $0x58] sm:$0xff] }
  0x1f   :  { %v74_v6 = vsub.s32 4, %v57_v1  ;;  %v78_v7 = vsub.s32 5, %v57_v1  ;;  %v82_v8 = vsub.s32 6, %v57_v1  ;;  %v86_v9 = vsub.s32 7, %v57_v1  ;;  %v50_v39 = vld [vmem:[#allocation5 + $0x60] sm:$0xff]  ;;  %v51_v40 = vld [vmem:[#allocation5 + $0x68] sm:$0xff]  ;;  %p198_p13 = por %p197_p12, %p196_p11 }
  0x20   :  { %v59_v13 = vrot.slane %v54_v11, %v58_v2  ;;  %v63_v14 = vrot.slane %v54_v11, %v62_v3  ;;  %v67_v16 = vrot.slane %v54_v11, %v66_v4  ;;  %v71_v18 = vrot.slane %v54_v11, %v70_v5  ;;  %v52_v45 = vld [vmem:[#allocation5 + $0x70] sm:$0xff]  ;;  %v53_v46 = vld [vmem:[#allocation5 + $0x78] sm:$0xff] }
  0x21   :  { %v75_v20 = vrot.slane %v54_v11, %v74_v6  ;;  %v79_v22 = vrot.slane %v54_v11, %v78_v7  ;;  %v83_v24 = vrot.slane %v54_v11, %v82_v8  ;;  %v87_v26 = vrot.slane %v54_v11, %v86_v9  ;;  %p199_p0 = pnand %p198_p13, %p192_p10 }
  0x22   :  { %v96_v27 = vmul.f32 %v59_v13, %v38_v10  ;;  %v97_v28 = vmul.f32 %v63_v14, %v39_v12  ;;  %v98_v29 = vmul.f32 %v67_v16, %v40_v15  ;;  %v99_v30 = vmul.f32 %v71_v18, %v41_v17 }
  0x23   :  { %v100_v34 = vmul.f32 %v75_v20, %v42_v19  ;;  %v101_v35 = vmul.f32 %v79_v22, %v43_v21  ;;  %v102_v36 = vmul.f32 %v83_v24, %v44_v23  ;;  %v103_v37 = vmul.f32 %v87_v26, %v45_v25 }
  0x24   :  { %112 = vst [vmem:[#allocation7] sm:$0xff] %v96_v27  ;;  %113 = vst [vmem:[#allocation7 + $0x8] sm:$0xff] %v97_v28  ;;  %v104_v41 = vmul.f32 %v59_v13, %v46_v31  ;;  %v105_v42 = vmul.f32 %v63_v14, %v47_v32  ;;  %v106_v43 = vmul.f32 %v67_v16, %v48_v33 }
  0x25   :  { %114 = vst [vmem:[#allocation7 + $0x10] sm:$0xff] %v98_v29  ;;  %115 = vst [vmem:[#allocation7 + $0x18] sm:$0xff] %v99_v30  ;;  %v107_v44 = vmul.f32 %v71_v18, %v49_v38  ;;  %v108_v47 = vmul.f32 %v75_v20, %v50_v39  ;;  %v109_v48 = vmul.f32 %v79_v22, %v51_v40 }
  0x26   :  { %116 = vst [vmem:[#allocation7 + $0x20] sm:$0xff] %v100_v34  ;;  %117 = vst [vmem:[#allocation7 + $0x28] sm:$0xff] %v101_v35  ;;  %v110_v49 = vmul.f32 %v83_v24, %v52_v45  ;;  %v111_v50 = vmul.f32 %v87_v26, %v53_v46 }
  0x27   :  { %118 = vst [vmem:[#allocation7 + $0x30] sm:$0xff] %v102_v36  ;;  %119 = vst [vmem:[#allocation7 + $0x38] sm:$0xff] %v103_v37 }
  0x28   :  { %120 = vst [vmem:[#allocation7 + $0x40] sm:$0xff] %v104_v41  ;;  %121 = vst [vmem:[#allocation7 + $0x48] sm:$0xff] %v105_v42 }
  0x29   :  { %122 = vst [vmem:[#allocation7 + $0x50] sm:$0xff] %v106_v43  ;;  %123 = vst [vmem:[#allocation7 + $0x58] sm:$0xff] %v107_v44 }
  0x2a   :  { %124 = vst [vmem:[#allocation7 + $0x60] sm:$0xff] %v108_v47  ;;  %125 = vst [vmem:[#allocation7 + $0x68] sm:$0xff] %v109_v48 }
  0x2b   :  { %126 = vst [vmem:[#allocation7 + $0x70] sm:$0xff] %v110_v49  ;;  %127 = vst [vmem:[#allocation7 + $0x78] sm:$0xff] %v111_v50 }
  0x2c   :  { %202 = shalt.err (!%p199_p0)
}
  0x2d   :  { %139 = dma.vmem_to_hbm [thread:$0]  %s134_s1, 2048, %s254_s2, [#allocation4], %s219_s17, %s219_s17, %s220_s18  }
  0x2e   :  { %215 = dma.done.wait [#allocation4], 2048  }
  0x2f   :  { %216 = vsyncadd [#allocation4], 4294965248 }
  0x30   :  { %143 = vsyncpa [#allocation3], 1 }
  0x31   :  { %144 = vsyncpa [#allocation6], 1 }
  0x32   :  { %145 = vsyncpa [#allocation4], 1 }

</bundles_post_ra>
